<compile_context>
chip_gen: v7x
topology: tpu7x:2x2x1
jax: 0.10.0
libtpu: 0.0.40
codegen_flags: <defaults>
</compile_context>

<pallas_src>
import jax
import jax.numpy as jnp
from jax.experimental import pallas as pl
from jax.experimental.pallas import tpu as pltpu


# ----------------------------------------------------------------------------
# Fused MLP kernel: softmax((relu(relu(x@W1+b1)@W2+b2))@W3+b3)
# ----------------------------------------------------------------------------
def _mlp_kernel(x_ref, w1_ref, b1_ref, w2_ref, b2_ref, w3_ref, b3_ref, o_ref):
    x = x_ref[...]                                                    # (tm, D) bf16
    h = jnp.dot(x, w1_ref[...], preferred_element_type=jnp.float32) + b1_ref[...]
    h = jnp.maximum(h, 0.0).astype(jnp.bfloat16)                      # (tm, 128)
    h = jnp.dot(h, w2_ref[...], preferred_element_type=jnp.float32) + b2_ref[...]
    h = jnp.maximum(h, 0.0).astype(jnp.bfloat16)                      # (tm, 64)
    logits = jnp.dot(h, w3_ref[...], preferred_element_type=jnp.float32) + b3_ref[...]
    # softmax(dim=1) over the lane-dense (padded-to-128) class axis.  Padded
    # lanes carry logit -1e30, so exp(logit - max) is exactly 0 there and the
    # valid probabilities are unchanged.
    m = jnp.max(logits, axis=-1, keepdims=True)
    e = jnp.exp(logits - m)
    inv = pl.reciprocal(jnp.sum(e, axis=-1, keepdims=True), approx=True)
    o_ref[...] = (e * inv).astype(o_ref.dtype)


def _pick_tile(n):
    """Batch tile: 8-row sublane minimum, >=2 grid steps for mid-size batches
    (v7x megacore), capped at 512 rows (~85% of HBM roofline per step)."""
    if n <= 8:
        return 8
    half = (n + 1) // 2
    return min(512, ((half + 7) // 8) * 8)


def mlp_forward(params, x, num_classes=10):
    """x: (N, H, W) or (N, D) -> softmax probabilities (N, num_classes)."""
    N = x.shape[0]
    # Flatten each (28, 28) image to 784 features and cast to bf16 for the MXU.
    # TODO(synk): the PyTorch module uses nn.Flatten(2, 1) (start_dim > end_dim,
    # which PyTorch rejects at runtime); the clear intent -- matching
    # Linear(28*28, 128) -- is a flatten to (N, 784), which is what we do here.
    x2 = x.reshape(N, -1).astype(jnp.bfloat16)
    D = x2.shape[1]

    w1, b1 = params["fc1"]
    w2, b2 = params["fc2"]
    w3, b3 = params["fc3"]
    H1, H2, CP = w1.shape[1], w2.shape[1], w3.shape[1]   # CP = lane-padded classes

    tm = _pick_tile(N)
    grid = (pl.cdiv(N, tm),)   # ragged last block handled by Pallas; no input pad

    out = pl.pallas_call(
        _mlp_kernel,
        out_shape=jax.ShapeDtypeStruct((N, CP), jnp.float32),
        grid_spec=pltpu.PrefetchScalarGridSpec(
            num_scalar_prefetch=0,
            grid=grid,
            in_specs=[
                pl.BlockSpec((tm, D), lambda i: (i, 0)),     # activation tile
                pl.BlockSpec((D, H1), lambda i: (0, 0)),     # W1 (in, out) bf16
                pl.BlockSpec((1, H1), lambda i: (0, 0)),     # b1 f32
                pl.BlockSpec((H1, H2), lambda i: (0, 0)),    # W2
                pl.BlockSpec((1, H2), lambda i: (0, 0)),     # b2
                pl.BlockSpec((H2, CP), lambda i: (0, 0)),    # W3 (padded to 128 cols)
                pl.BlockSpec((1, CP), lambda i: (0, 0)),     # b3 (-1e30 pad lanes)
            ],
            out_specs=pl.BlockSpec((tm, CP), lambda i: (i, 0)),
        ),
        compiler_params=pltpu.CompilerParams(
            dimension_semantics=("parallel",)),
    )(x2, w1, b1, w2, b2, w3, b3)
    return out[:, :num_classes]


# ----------------------------------------------------------------------------
# Parameter init: xavier_uniform weights, zero biases (matching reset_params).
# Weights are stored pre-transposed (in, out) and in bf16; the final layer is
# lane-padded to 128 classes (zero weight columns, -1e30 bias lanes).
# ----------------------------------------------------------------------------
def _xavier_uniform_t(key, fan_in, fan_out, dtype=jnp.bfloat16):
    bound = (6.0 / (fan_in + fan_out)) ** 0.5
    w = jax.random.uniform(key, (fan_in, fan_out), jnp.float32, -bound, bound)
    return w.astype(dtype)


def init_params(key, input_shape=(28, 28), num_classes=10):
    d = input_shape[0] * input_shape[1]
    k1, k2, k3 = jax.random.split(key, 3)
    cp = max(128, ((num_classes + 127) // 128) * 128)     # lane-dense class dim
    w3 = _xavier_uniform_t(k3, 64, num_classes)           # xavier over true fan_out
    w3 = jnp.pad(w3, ((0, 0), (0, cp - num_classes)))     # zero padded columns
    b3 = jnp.full((1, cp), -1e30, jnp.float32).at[0, :num_classes].set(0.0)
    return {
        "fc1": (_xavier_uniform_t(k1, d, 128), jnp.zeros((1, 128), jnp.float32)),
        "fc2": (_xavier_uniform_t(k2, 128, 64), jnp.zeros((1, 64), jnp.float32)),
        "fc3": (w3, b3),
    }


# TODO(synk): training-mode branch (returns raw logits, no softmax) is not
# exposed; it would be the same kernel with the softmax epilogue skipped.


if __name__ == "__main__":
    key = jax.random.PRNGKey(0)
    k_x, k_p = jax.random.split(key)
    x = jax.random.normal(k_x, (2, 28, 28), jnp.float32)   # batch=2, 28x28 input
    params = init_params(k_p, input_shape=(28, 28), num_classes=10)

    out = jax.jit(mlp_forward)(params, x)
    out = jax.block_until_ready(out)

    assert out.shape == (2, 10), out.shape
    assert bool(jnp.all(jnp.isfinite(out)))
    # softmax rows must sum to ~1 (bf16 inputs + approx reciprocal => loose tol)
    assert bool(jnp.all(jnp.abs(jnp.sum(out, axis=1) - 1.0) < 1e-2))
    assert bool(jnp.all(out >= 0.0))
    print("KERNEL_OK")
</pallas_src>

<mosaic_0001>
module attributes {stable_mosaic.version = 11 : i64} {
  func.func @_mlp_kernel(%arg0: i32, %arg1: memref<8x784xbf16, #tpu.memory_space<vmem>>, %arg2: memref<784x128xbf16, #tpu.memory_space<vmem>>, %arg3: memref<1x128xf32, #tpu.memory_space<vmem>>, %arg4: memref<128x64xbf16, #tpu.memory_space<vmem>>, %arg5: memref<1x64xf32, #tpu.memory_space<vmem>>, %arg6: memref<64x128xbf16, #tpu.memory_space<vmem>>, %arg7: memref<1x128xf32, #tpu.memory_space<vmem>>, %arg8: memref<8x128xf32, #tpu.memory_space<vmem>>) attributes {dimension_semantics = [#tpu.dimension_semantics<parallel>], iteration_bounds = array<i64: 1>, scalar_prefetch = 0 : i64, scratch_operands = 0 : i64, tpu.core_type = #tpu.core_type<tc>, window_params = [{transform_indices = @transform_0, window_bounds = array<i64: 8, 784>}, {pipeline_mode = #tpu.pipeline_mode<synchronous>, transform_indices = @transform_1, window_bounds = array<i64: 784, 128>}, {pipeline_mode = #tpu.pipeline_mode<synchronous>, transform_indices = @transform_2, window_bounds = array<i64: 1, 128>}, {pipeline_mode = #tpu.pipeline_mode<synchronous>, transform_indices = @transform_3, window_bounds = array<i64: 128, 64>}, {pipeline_mode = #tpu.pipeline_mode<synchronous>, transform_indices = @transform_4, window_bounds = array<i64: 1, 64>}, {pipeline_mode = #tpu.pipeline_mode<synchronous>, transform_indices = @transform_5, window_bounds = array<i64: 64, 128>}, {pipeline_mode = #tpu.pipeline_mode<synchronous>, transform_indices = @transform_6, window_bounds = array<i64: 1, 128>}, {transform_indices = @transform_7, window_bounds = array<i64: 8, 128>}]} {
    %c0 = arith.constant 0 : index
    %c0_0 = arith.constant 0 : index
    %0 = vector.load %arg1[%c0, %c0_0] : memref<8x784xbf16, #tpu.memory_space<vmem>>, vector<8x784xbf16>
    %c0_1 = arith.constant 0 : index
    %c0_2 = arith.constant 0 : index
    %1 = vector.load %arg2[%c0_1, %c0_2] : memref<784x128xbf16, #tpu.memory_space<vmem>>, vector<784x128xbf16>
    %cst = arith.constant dense<0.000000e+00> : vector<8x128xf32>
    %2 = tpu.matmul %0, %1, %cst {dimension_numbers = #tpu.dot_dimension_numbers<[1], [0], [0], [1], [0, 0, 1, 1], [], []>} : vector<8x784xbf16>, vector<784x128xbf16>, vector<8x128xf32> -> vector<8x128xf32>
    %c0_3 = arith.constant 0 : index
    %c0_4 = arith.constant 0 : index
    %3 = vector.load %arg3[%c0_3, %c0_4] : memref<1x128xf32, #tpu.memory_space<vmem>>, vector<1x128xf32>
    %4 = vector.broadcast %3 : vector<1x128xf32> to vector<8x128xf32>
    %5 = arith.addf %2, %4 : vector<8x128xf32>
    %cst_5 = arith.constant 0.000000e+00 : f32
    %6 = vector.broadcast %cst_5 : f32 to vector<8x128xf32>
    %7 = arith.maximumf %5, %6 : vector<8x128xf32>
    %8 = arith.truncf %7 : vector<8x128xf32> to vector<8x128xbf16>
    %c0_6 = arith.constant 0 : index
    %c0_7 = arith.constant 0 : index
    %9 = vector.load %arg4[%c0_6, %c0_7] : memref<128x64xbf16, #tpu.memory_space<vmem>>, vector<128x64xbf16>
    %cst_8 = arith.constant dense<0.000000e+00> : vector<8x64xf32>
    %10 = tpu.matmul %8, %9, %cst_8 {dimension_numbers = #tpu.dot_dimension_numbers<[1], [0], [0], [1], [0, 0, 1, 1], [], []>} : vector<8x128xbf16>, vector<128x64xbf16>, vector<8x64xf32> -> vector<8x64xf32>
    %c0_9 = arith.constant 0 : index
    %c0_10 = arith.constant 0 : index
    %11 = vector.load %arg5[%c0_9, %c0_10] : memref<1x64xf32, #tpu.memory_space<vmem>>, vector<1x64xf32>
    %12 = vector.broadcast %11 : vector<1x64xf32> to vector<8x64xf32>
    %13 = arith.addf %10, %12 : vector<8x64xf32>
    %cst_11 = arith.constant 0.000000e+00 : f32
    %14 = vector.broadcast %cst_11 : f32 to vector<8x64xf32>
    %15 = arith.maximumf %13, %14 : vector<8x64xf32>
    %16 = arith.truncf %15 : vector<8x64xf32> to vector<8x64xbf16>
    %c0_12 = arith.constant 0 : index
    %c0_13 = arith.constant 0 : index
    %17 = vector.load %arg6[%c0_12, %c0_13] : memref<64x128xbf16, #tpu.memory_space<vmem>>, vector<64x128xbf16>
    %cst_14 = arith.constant dense<0.000000e+00> : vector<8x128xf32>
    %18 = tpu.matmul %16, %17, %cst_14 {dimension_numbers = #tpu.dot_dimension_numbers<[1], [0], [0], [1], [0, 0, 1, 1], [], []>} : vector<8x64xbf16>, vector<64x128xbf16>, vector<8x128xf32> -> vector<8x128xf32>
    %c0_15 = arith.constant 0 : index
    %c0_16 = arith.constant 0 : index
    %19 = vector.load %arg7[%c0_15, %c0_16] : memref<1x128xf32, #tpu.memory_space<vmem>>, vector<1x128xf32>
    %20 = vector.broadcast %19 : vector<1x128xf32> to vector<8x128xf32>
    %21 = arith.addf %18, %20 : vector<8x128xf32>
    %cst_17 = arith.constant dense<0xFF800000> : vector<8xf32>
    %22 = vector.multi_reduction <maximumf>, %21, %cst_17 [1] : vector<8x128xf32> to vector<8xf32>
    %23 = vector.shape_cast %22 : vector<8xf32> to vector<8x1xf32>
    %24 = vector.broadcast %23 : vector<8x1xf32> to vector<8x128xf32>
    %25 = arith.subf %21, %24 : vector<8x128xf32>
    %26 = math.exp %25 : vector<8x128xf32>
    %cst_18 = arith.constant dense<0.000000e+00> : vector<8xf32>
    %27 = vector.multi_reduction <add>, %26, %cst_18 [1] : vector<8x128xf32> to vector<8xf32>
    %28 = vector.shape_cast %27 : vector<8xf32> to vector<8x1xf32>
    %29 = tpu.reciprocal %28 {approx = true} : vector<8x1xf32> -> vector<8x1xf32>
    %30 = vector.broadcast %29 : vector<8x1xf32> to vector<8x128xf32>
    %31 = arith.mulf %26, %30 : vector<8x128xf32>
    %c0_19 = arith.constant 0 : index
    %c0_20 = arith.constant 0 : index
    %32 = vector.load %arg8[%c0_19, %c0_20] : memref<8x128xf32, #tpu.memory_space<vmem>>, vector<8x128xf32>
    tpu.vector_store %arg8[%c0_19, %c0_20], %31 {strides = array<i32>} : memref<8x128xf32, #tpu.memory_space<vmem>>, vector<8x128xf32>,
    return
  }
  func.func @transform_0(%arg0: i32) -> (i32, i32) {
    %c0_i32 = arith.constant 0 : i32
    %c0_i32_0 = arith.constant 0 : i32
    return %arg0, %c0_i32 : i32, i32
  }
  func.func @transform_1(%arg0: i32) -> (i32, i32) {
    %c0_i32 = arith.constant 0 : i32
    %c0_i32_0 = arith.constant 0 : i32
    %c0_i32_1 = arith.constant 0 : i32
    return %c0_i32, %c0_i32_0 : i32, i32
  }
  func.func @transform_2(%arg0: i32) -> (i32, i32) {
    %c0_i32 = arith.constant 0 : i32
    %c0_i32_0 = arith.constant 0 : i32
    %c0_i32_1 = arith.constant 0 : i32
    return %c0_i32, %c0_i32_0 : i32, i32
  }
  func.func @transform_3(%arg0: i32) -> (i32, i32) {
    %c0_i32 = arith.constant 0 : i32
    %c0_i32_0 = arith.constant 0 : i32
    %c0_i32_1 = arith.constant 0 : i32
    return %c0_i32, %c0_i32_0 : i32, i32
  }
  func.func @transform_4(%arg0: i32) -> (i32, i32) {
    %c0_i32 = arith.constant 0 : i32
    %c0_i32_0 = arith.constant 0 : i32
    %c0_i32_1 = arith.constant 0 : i32
    return %c0_i32, %c0_i32_0 : i32, i32
  }
  func.func @transform_5(%arg0: i32) -> (i32, i32) {
    %c0_i32 = arith.constant 0 : i32
    %c0_i32_0 = arith.constant 0 : i32
    %c0_i32_1 = arith.constant 0 : i32
    return %c0_i32, %c0_i32_0 : i32, i32
  }
  func.func @transform_6(%arg0: i32) -> (i32, i32) {
    %c0_i32 = arith.constant 0 : i32
    %c0_i32_0 = arith.constant 0 : i32
    %c0_i32_1 = arith.constant 0 : i32
    return %c0_i32, %c0_i32_0 : i32, i32
  }
  func.func @transform_7(%arg0: i32) -> (i32, i32) {
    %c0_i32 = arith.constant 0 : i32
    %c0_i32_0 = arith.constant 0 : i32
    return %arg0, %c0_i32 : i32, i32
  }
}

</mosaic_0001>

<bundles_post_ra>
// kernel: mlp_forward.1
= control target key start
LH: loop header
LB: loop body
LE: loop exit
PB: predicated region body
PF: predicated region fallthrough
CT: control target
= control target key end

     0   :  { %12 = vsyncpa [#allocation3], 0  ;;  %s1374_s0 = inlined_call_operand.vmem [shape: bf16[2,784], index: 0, kind: input, shape index: {}]   ;;  %s1375_s1 = inlined_call_operand.hbm [shape: bf16[784,128], index: 1, kind: input, shape index: {}]   ;;  %s1376_s2 = inlined_call_operand.vmem [shape: f32[1,128], index: 2, kind: input, shape index: {}]   ;;  %s1377_s3 = inlined_call_operand.vmem [shape: bf16[128,64], index: 3, kind: input, shape index: {}]   ;;  %s1378_s4 = inlined_call_operand.vmem [shape: f32[1,64], index: 4, kind: input, shape index: {}]   ;;  %s1379_s5 = inlined_call_operand.vmem [shape: bf16[64,128], index: 5, kind: input, shape index: {}]   ;;  %s1380_s6 = inlined_call_operand.vmem [shape: f32[1,128], index: 6, kind: input, shape index: {}]   ;;  %s1381_s7 = inlined_call_operand.hbm [shape: f32[2,128], index: 7, kind: output, shape index: {}]  }
   0x1   :  { %13 = vsyncpa [#allocation4], 0  ;;  %s1225_s24 = smov [#allocation2]   ;;  %s1177_s28 = scalar_lea.hbm %s1375_s1, 6272 }
   0x2   :  { %s21_s25 = sshll.u32 %s1225_s24, 4  ;;  %p1178_p0 = scmp.ne.s32.totalorder %s1375_s1, %s1177_s28  ;;  %s22_s25 = int_to_ptr.vmem [resolvable:$true] %s21_s25 }
   0x3   :  { %p1181_p1 = scmp.lt.u32.totalorder %s1177_s28, %s1375_s1 }
   0x5   :  { %p1183_p2 = pnand %p1181_p1, %p1178_p0 }
   0x7   :  { %1186 = shalt.err (!%p1183_p2)
}
   0x8   :  { %s1187_s10 = scalar_lea.vmem %s22_s25, 6272  ;;  %p1192_p4 = scmp.lt.s32.totalorder %s22_s25, %s22_s25 }
   0x9   :  { %p1188_p3 = scmp.ne.s32.totalorder %s22_s25, %s1187_s10  ;;  %p1193_p5 = scmp.lt.s32.totalorder %s1187_s10, %s1187_s10 }
   0xb   :  { %p1194_p6 = por %p1193_p5, %p1192_p4 }
   0xd   :  { %p1195_p7 = pnand %p1194_p6, %p1188_p3 }
   0xf   :  { %1198 = shalt.err (!%p1195_p7)
}
  0x10   :  { %s1226_s11 = smov 64   ;;  %s1227_s12 = smov 4  }
  0x11   :  { %27 = dma.hbm_to_vmem [thread:$0]  %s1375_s1, 6272, %s22_s25, [#allocation3], %s1226_s11, %s1226_s11, %s1227_s12  }
  0x12   :  { %1221 = dma.done.wait [#allocation3], 6272  }
  0x13   :  { %1222 = vsyncadd [#allocation3], 4294961024  ;;  %v1106_v0 = vld [vmem:[#allocation2 + $0x40] sm:$0xff]   ;;  %v1110_v4 = vld [vmem:[#allocation2 + $0x48] sm:$0xff]   ;;  %v1228_v23 = vmov 1966171168   ;;  %v162_v25 = vlaneseq }
  0x14   :  { %v1107_v1 = vld [vmem:[#allocation2] sm:$0xff]   ;;  %977 = vmatprep.subr.bf16.mxu0 %v1106_v0  ;;  %v1111_v5 = vld [vmem:[#allocation2 + $0x8] sm:$0xff]   ;;  %v1114_v8 = vld [vmem:[#allocation2 + $0x50] sm:$0xff]   ;;  %v160_v24 = vunpack.c.l.s4 %v1228_v23  ;;  %v1229_v49 = vmov 0.0   ;;  %vm1230_vm0 = vmmov 0   ;;  %vm522_vm1 = vcmask 130048  }
  0x15   :  { %v1108_v2 = vld [vmem:[#allocation2 + $0xc0] sm:$0xff]   ;;  %978 = vmatpush3.bf16.msra.mxu0 %v1107_v1  ;;  %v1112_v6 = vld [vmem:[#allocation2 + $0xc8] sm:$0xff]   ;;  %v1115_v9 = vld [vmem:[#allocation2 + $0x10] sm:$0xff]   ;;  %v163_v31 = vshrl.u32 %v162_v25, 7  ;;  %vm840_vm2 = vcmask 523264  }
  0x16   :  { %v1109_v3 = vld [vmem:[#allocation2 + $0x80] sm:$0xff]   ;;  %999 = vmatprep.subr.bf16.mxu1 %v1108_v2  ;;  %979 = vmatprep.subr.bf16.mxu0 %v1110_v4  ;;  %v1113_v7 = vld [vmem:[#allocation2 + $0x88] sm:$0xff]   ;;  %v1116_v10 = vld [vmem:[#allocation2 + $0xd0] sm:$0xff]   ;;  %v161_v30 = vunpack.c.0.s8 %v160_v24 }
  0x17   :  { %1000 = vmatpush3.bf16.msra.mxu1 %v1109_v3  ;;  %v1117_v11 = vld [vmem:[#allocation2 + $0x90] sm:$0xff]   ;;  %v1118_v12 = vld [vmem:[#allocation2 + $0x58] sm:$0xff]   ;;  %v1122_v16 = vld [vmem:[#allocation2 + $0x60] sm:$0xff]  }
  0x18   :  { %1001 = vmatprep.subr.bf16.mxu1 %v1112_v6  ;;  %v1119_v13 = vld [vmem:[#allocation2 + $0x18] sm:$0xff]   ;;  %v1123_v17 = vld [vmem:[#allocation2 + $0x20] sm:$0xff]   ;;  %v1126_v20 = vld [vmem:[#allocation2 + $0x68] sm:$0xff]   ;;  %v164_v36 = vsub.s32 %v161_v30, %v163_v31 }
  0x19   :  { %980 = vmatpush3.bf16.msra.mxu0 %v1111_v5  ;;  %v1120_v14 = vld [vmem:[#allocation2 + $0xd8] sm:$0xff]   ;;  %v1124_v18 = vld [vmem:[#allocation2 + $0xe0] sm:$0xff]   ;;  %v1127_v21 = vld [vmem:[#allocation2 + $0x28] sm:$0xff]  }
  0x1a   :  { %981 = vmatprep.subr.bf16.mxu0 %v1114_v8  ;;  %v1121_v15 = vld [vmem:[#allocation2 + $0x98] sm:$0xff]   ;;  %v1125_v19 = vld [vmem:[#allocation2 + $0xa0] sm:$0xff]   ;;  %v1128_v22 = vld [vmem:[#allocation2 + $0xe8] sm:$0xff]  }
  0x1b   :  { %1002 = vmatpush3.bf16.msra.mxu1 %v1113_v7  ;;  %v1129_v26 = vld [vmem:[#allocation2 + $0xa8] sm:$0xff]   ;;  %v1130_v27 = vld [vmem:[#allocation2 + $0x70] sm:$0xff]   ;;  %v1134_v33 = vld [vmem:[#allocation2 + $0x78] sm:$0xff]  }
  0x1c   :  { %1003 = vmatprep.subr.bf16.mxu1 %v1116_v10  ;;  %v1131_v28 = vld [vmem:[#allocation2 + $0x30] sm:$0xff]   ;;  %v1135_v34 = vld [vmem:[#allocation2 + $0x38] sm:$0xff]   ;;  %v1137_v37 = vld [vmem:[%s1374_s0] ss:$7 sps:$4 sm:$0xff]  }
  0x1d   :  { %982 = vmatpush3.bf16.msra.mxu0 %v1115_v9  ;;  %v1132_v29 = vld [vmem:[#allocation2 + $0xf0] sm:$0xff]   ;;  %v1136_v35 = vld [vmem:[#allocation2 + $0xf8] sm:$0xff]   ;;  %v1139_v39 = vld [vmem:[%s1374_s0 + $0x4] ss:$7 sps:$4 sm:$0x77]   ;;  %v165_v41 = vrot.slane %v1137_v37, %v164_v36 }
  0x1e   :  { %983 = vmatprep.subr.bf16.mxu0 %v1118_v12  ;;  %v1133_v32 = vld [vmem:[#allocation2 + $0xb0] sm:$0xff]   ;;  %v1143_v43 = vld [vmem:[#allocation2 + $0xb8] sm:$0xff]   ;;  %v1144_v44 = vld [vmem:[#allocation2 + $0x140] sm:$0xff]   ;;  %v172_v45 = vrot.slane %v1139_v39, %v164_v36 }
  0x1f   :  { %1004 = vmatpush3.bf16.msra.mxu1 %v1117_v11  ;;  %v1140_v38 = vld [vmem:[%s1374_s0 + $0xe] ss:$7 sps:$4 sm:$0xff]   ;;  %v1142_v40 = vld [vmem:[%s1374_s0 + $0x12] ss:$7 sps:$4 sm:$0x77]   ;;  %v1145_v53 = vld [vmem:[#allocation2 + $0x100] sm:$0xff]  }
  0x20   :  { %1005 = vmatprep.subr.bf16.mxu1 %v1120_v14  ;;  %v179_v42 = vrot.slane %v1140_v38, %v164_v36  ;;  %v186_v46 = vrot.slane %v1142_v40, %v164_v36  ;;  %v1146_v54 = vld [vmem:[#allocation2 + $0x148] sm:$0xff]   ;;  %v1148_v59 = vld [vmem:[#allocation2 + $0x150] sm:$0xff]   ;;  %v1150_v62 = vld [vmem:[#allocation2 + $0x158] sm:$0xff]  }
  0x21   :  { %984 = vmatpush3.bf16.msra.mxu0 %v1119_v13  ;;  %v1147_v58 = vld [vmem:[#allocation2 + $0x108] sm:$0xff]   ;;  %v1149_v61 = vld [vmem:[#allocation2 + $0x110] sm:$0xff]   ;;  %v1151_v0 = vld [vmem:[#allocation2 + $0x118] sm:$0xff]  }
  0x22   :  { %985 = vmatprep.subr.bf16.mxu0 %v1122_v16  ;;  %v188_v47 = vcombine.high %v165_v41, %v179_v42  ;;  %v187_v48 = vcombine.low %v165_v41, %v179_v42  ;;  %v190_v50 = vcombine.high %v172_v45, %v186_v46  ;;  %v189_v60 = vcombine.low %v172_v45, %v186_v46  ;;  %v1152_v1 = vld [vmem:[#allocation2 + $0x160] sm:$0xff]   ;;  %v1154_v5 = vld [vmem:[#allocation2 + $0x168] sm:$0xff]   ;;  %v1156_v7 = vld [vmem:[#allocation2 + $0x170] sm:$0xff]  }
  0x23   :  { %1006 = vmatpush3.bf16.msra.mxu1 %v1121_v15  ;;  %v1160_v2 = vld [vmem:[#allocation2 + $0x180] sm:$0xff]   ;;  %v1155_v6 = vld [vmem:[#allocation2 + $0x128] sm:$0xff]   ;;  %v1157_v8 = vld [vmem:[#allocation2 + $0x130] sm:$0xff]  }
  0x24   :  { %1007 = vmatprep.subr.bf16.mxu1 %v1124_v18  ;;  %v211_v51 = vrot.slane %v188_v47, %v164_v36  ;;  %v197_v52 = vrot.slane %v187_v48, %v164_v36  ;;  %v218_v57 = vrot.slane %v190_v50, %v164_v36  ;;  %v204_v63 = vrot.slane %v189_v60, %v164_v36  ;;  %v1153_v3 = vld [vmem:[#allocation2 + $0x120] sm:$0xff]   ;;  %v1158_v9 = vld [vmem:[#allocation2 + $0x178] sm:$0xff]   ;;  %v1162_v12 = vld [vmem:[%s1377_s3 + $0x8] sm:$0xff]  }
  0x25   :  { %986 = vmatpush3.bf16.msra.mxu0 %v1123_v17  ;;  %v1159_v10 = vld [vmem:[#allocation2 + $0x138] sm:$0xff]   ;;  %v1161_v11 = vld [vmem:[%s1377_s3] sm:$0xff]   ;;  %v1163_v13 = vld [vmem:[%s1377_s3 + $0x10] sm:$0xff]  }
  0x26   :  { %987 = vmatprep.subr.bf16.mxu0 %v1126_v20  ;;  %558 = vmatprep.mubr.bf16.mxu0 %v211_v51  ;;  %v221_v55 = vcombine.high %v211_v51, %v211_v51  ;;  %v219_v56 = vcombine.high %v197_v52, %v197_v52  ;;  %v220_v4 = vcombine.high %v204_v63, %v204_v63  ;;  %v1164_v14 = vld [vmem:[%s1377_s3 + $0x18] sm:$0xff]   ;;  %v1165_v15 = vld [vmem:[%s1377_s3 + $0x20] sm:$0xff]   ;;  %v1166_v16 = vld [vmem:[%s1377_s3 + $0x28] sm:$0xff]  }
  0x27   :  { %1008 = vmatpush3.bf16.msra.mxu1 %v1125_v19  ;;  %v1167_v17 = vld [vmem:[%s1377_s3 + $0x30] sm:$0xff]   ;;  %v1168_v18 = vld [vmem:[%s1377_s3 + $0x38] sm:$0xff]   ;;  %v1169_v19 = vld [vmem:[%s1379_s5] sm:$0xff]  }
  0x28   :  { %1009 = vmatprep.subr.bf16.mxu1 %v1128_v22  ;;  %598 = vmatprep.mubr.bf16.mxu1 %v221_v55  ;;  %v1170_v20 = vld [vmem:[%s1379_s5 + $0x8] sm:$0xff]   ;;  %v911_v22 = vld [vmem:[%s1376_s2] ss:$0 sm:$0xff]  ;;  %v1171_v47 = vld [vmem:[%s1379_s5 + $0x10] sm:$0xff]  }
  0x29   :  { %988 = vmatpush3.bf16.msra.mxu0 %v1127_v21  ;;  %v1172_v48 = vld [vmem:[%s1379_s5 + $0x18] sm:$0xff]   ;;  %v962_v50 = vld [vmem:[%s1378_s4] ss:$0 sm:$0xff] }
  0x2a   :  { %989 = vmatprep.subr.bf16.mxu0 %v1130_v27 }
  0x2b   :  { %1010 = vmatpush3.bf16.msra.mxu1 %v1129_v26 }
  0x2c   :  { %1011 = vmatprep.subr.bf16.mxu1 %v1132_v29 }
  0x2d   :  { %990 = vmatpush3.bf16.msra.mxu0 %v1131_v28 }
  0x2e   :  { %991 = vmatprep.subr.bf16.mxu0 %v1134_v33 }
  0x2f   :  { %1012 = vmatpush3.bf16.msra.mxu1 %v1133_v32 }
  0x30   :  { %1013 = vmatprep.subr.bf16.mxu1 %v1136_v35 }
  0x31   :  { %992 = vmatpush3.bf16.msra.mxu0 %v1135_v34 }
  0x32   :  { %1021 = vmatprep.subr.bf16.mxu0 %v1144_v44 }
  0x33   :  { %1014 = vmatpush3.bf16.msra.mxu1 %v1143_v43 }
  0x34   :  { %1059 = vmatprep.subr.bf16.mxu1 %v1229_v49  ;;  %559 = vmatmul.mubr.bf16.vlgmr.msra.gmra.mrb[0].mxu0 %v197_v52 }
  0x35   :  { %1022 = vmatpush3.bf16.msra.mxu0 %v1145_v53  ;;  %638 = vmatprep.mubr.bf16.mxu0 %v218_v57 }
  0x36   :  { %599 = vmatmul.mubr.bf16.vlgmr.msra.gmra.mrb[0].mxu1 %v219_v56  ;;  %1023 = vmatprep.subr.bf16.mxu0 %v1146_v54 }
  0x37   :  { %1061 = vmatprep.mubr.msk.bf16.mxu1 %vm1230_vm0, %v1229_v49  ;;  %1060 = vmatpush3.bf16.msra.mxu1 %v1160_v2 }
  0x38   :  { %1065 = vmatprep.subr.bf16.mxu1 %v1229_v49 }
  0x39   :  { %1024 = vmatpush3.bf16.msra.mxu0 %v1147_v58 }
  0x3a   :  { %1025 = vmatprep.subr.bf16.mxu0 %v1148_v59 }
  0x3d   :  { %1026 = vmatpush3.bf16.msra.mxu0 %v1149_v61 }
  0x3e   :  { %1027 = vmatprep.subr.bf16.mxu0 %v1150_v62  ;;  %1062 = vmatmul.mubr.msk.bf16.vlgmr.msra.gmra.mrb[4].mxu1 %vm522_vm1, %v220_v4 }
  0x3f   :  { %1081 = vmatprep.mubr.msk.bf16.mxu1 %vm1230_vm0, %v1229_v49  ;;  %1066 = vmatpush3.bf16.msra.mxu1 %v1161_v11 }
  0x40   :  { %1067 = vmatprep.subr.bf16.mxu1 %v1229_v49 }
  0x41   :  { %1028 = vmatpush3.bf16.msra.mxu0 %v1151_v0 }
  0x42   :  { %1029 = vmatprep.subr.bf16.mxu0 %v1152_v1 }
  0x43   :  { %1068 = vmatpush3.bf16.msra.mxu1 %v1162_v12 }
  0x44   :  { %1069 = vmatprep.subr.bf16.mxu1 %v1229_v49 }
  0x45   :  { %1030 = vmatpush3.bf16.msra.mxu0 %v1153_v3 }
  0x46   :  { %1031 = vmatprep.subr.bf16.mxu0 %v1154_v5 }
  0x47   :  { %1070 = vmatpush3.bf16.msra.mxu1 %v1163_v13 }
  0x48   :  { %1071 = vmatprep.subr.bf16.mxu1 %v1229_v49 }
  0x49   :  { %1032 = vmatpush3.bf16.msra.mxu0 %v1155_v6 }
  0x4a   :  { %1033 = vmatprep.subr.bf16.mxu0 %v1156_v7 }
  0x4b   :  { %1072 = vmatpush3.bf16.msra.mxu1 %v1164_v14 }
  0x4c   :  { %1073 = vmatprep.subr.bf16.mxu1 %v1229_v49 }
  0x4d   :  { %1034 = vmatpush3.bf16.msra.mxu0 %v1157_v8 }
  0x4e   :  { %1035 = vmatprep.subr.bf16.mxu0 %v1158_v9 }
  0x4f   :  { %1074 = vmatpush3.bf16.msra.mxu1 %v1165_v15 }
  0x50   :  { %1075 = vmatprep.subr.bf16.mxu1 %v1229_v49 }
  0x51   :  { %1036 = vmatpush3.bf16.msra.mxu0 %v1159_v10 }
  0x52   :  { %1085 = vmatprep.subr.bf16.mxu0 %v1229_v49 }
  0x53   :  { %1076 = vmatpush3.bf16.msra.mxu1 %v1166_v16 }
  0x54   :  { %639 = vmatmul.mubr.bf16.vlgmr.msra.gmra.mrb[4].mxu0 %v204_v63  ;;  %1077 = vmatprep.subr.bf16.mxu1 %v1229_v49 }
  0x55   :  { %1093 = vmatprep.mubr.msk.bf16.mxu0 %vm1230_vm0, %v1229_v49  ;;  %1086 = vmatpush3.bf16.msra.mxu0 %v1169_v19 }
  0x56   :  { %1087 = vmatprep.subr.bf16.mxu0 %v1229_v49 }
  0x57   :  { %1078 = vmatpush3.bf16.msra.mxu1 %v1167_v17 }
  0x58   :  { %1079 = vmatprep.subr.bf16.mxu1 %v1229_v49 }
  0x59   :  { %1088 = vmatpush3.bf16.msra.mxu0 %v1170_v20 }
  0x5a   :  { %1089 = vmatprep.subr.bf16.mxu0 %v1229_v49 }
  0x5b   :  { %1080 = vmatpush3.bf16.msra.mxu1 %v1168_v18 }
  0x5d   :  { %1090 = vmatpush3.bf16.msra.mxu0 %v1171_v47 }
  0x5e   :  { %1091 = vmatprep.subr.bf16.mxu0 %v1229_v49  ;;  %v971_v49 = vld [vmem:[%s1380_s6] ss:$0 sm:$0xff] }
  0x61   :  { %1092 = vmatpush3.bf16.msra.mxu0 %v1172_v48 }
 0x107   :  { %v993_v21 = vpop.f32.mrb[0].mxu0 }
 0x108   :  { %v994_v23 = vpop.f32.mrb[1].mxu0 }
 0x109   :  { %v995_v24 = vadd.f32 %v994_v23, %v993_v21  ;;  %v996_v25 = vpop.f32.mrb[2].mxu0  ;;  %v1015_v26 = vpop.f32.mrb[0].mxu1 }
 0x10a   :  { %v997_v27 = vpop.f32.mrb[3].mxu0  ;;  %v1016_v28 = vpop.f32.mrb[1].mxu1 }
 0x10b   :  { %v561_v29 = vadd.f32 %v995_v24, %v911_v22  ;;  %v1017_v30 = vadd.f32 %v1016_v28, %v1015_v26  ;;  %v1018_v31 = vpop.f32.mrb[2].mxu1 }
 0x10c   :  { %v1019_v32 = vpop.f32.mrb[3].mxu1 }
 0x10d   :  { %v601_v33 = vadd.f32 %v1017_v30, %v561_v29 }
 0x111   :  { %v680_v34 = vpop.f32.mrb[4].mxu1 }
 0x112   :  { %v1063_v35 = vpop.f32.mrb[5].mxu1 }
 0x113   :  { %v683_v36 = vpop.f32.mrb[6].mxu1 }
 0x114   :  { %v1064_v37 = vpop.f32.mrb[7].mxu1 }
 0x127   :  { %v1037_v38 = vpop.f32.mrb[4].mxu0 }
 0x128   :  { %v1038_v39 = vpop.f32.mrb[5].mxu0 }
 0x129   :  { %v1039_v40 = vadd.f32 %v1038_v39, %v1037_v38  ;;  %v1040_v41 = vpop.f32.mrb[6].mxu0 }
 0x12a   :  { %v1041_v42 = vpop.f32.mrb[7].mxu0 }
 0x12b   :  { %v641_v43 = vadd.f32 %v1039_v40, %v601_v33 }
 0x12d   :  { %v681_v44 = vadd.f32 %v680_v34, %v641_v43 }
 0x12f   :  { %v686_v45 = vmax.f32 %v681_v44, 0.0 }
 0x131   :  { %v687_v46 = vpack.c.bf16 %v686_v45, %v686_v45 }
 0x133   :  { %1082 = vmatmul.mubr.bf16.vlgmr.msra.gmra.mrb[8].mxu1 %v687_v46 }
 0x206   :  { %v793_v51 = vpop.f32.mrb[8].mxu1 }
 0x207   :  { %v794_v52 = vadd.f32 %v962_v50, %v793_v51  ;;  %v1083_v53 = vpop.f32.mrb[9].mxu1 }
 0x208   :  { %v796_v54 = vpop.f32.mrb[10].mxu1 }
 0x209   :  { %v799_v55 = vmax.f32 %v794_v52, 0.0  ;;  %v1084_v56 = vpop.f32.mrb[11].mxu1 }
 0x20b   :  { %v800_v57 = vpack.c.bf16 %v799_v55, %v799_v55 }
 0x20d   :  { %1094 = vmatmul.mubr.msk.bf16.vlgmr.msra.gmra.mrb[8].mxu0 %vm840_vm2, %v800_v57 }
 0x2e0   :  { %v878_v58 = vpop.f32.mrb[8].mxu0 }
 0x2e1   :  { %v879_v59 = vadd.f32 %v971_v49, %v878_v58  ;;  %v1095_v60 = vpop.f32.mrb[9].mxu0 }
 0x2e2   :  { %v881_v61 = vpop.f32.mrb[10].mxu0 }
 0x2e3   :  { %884 = vmax.xlane.f32.xlu0 %v879_v59  ;;  %v1096_v62 = vpop.f32.mrb[11].mxu0 }
 0x370   :  { %v885_v63 = vpop.xlane.xlu0 %884 }
 0x371   :  { %v886_v0 = vsub.f32 %v879_v59, %v885_v63 }
 0x373   :  { %v887_v1 = vmul.f32 1.442695, %v886_v0 }
 0x375   :  { %1173 = vpow2.f32 %v887_v1 }
 0x37f   :  { %v1174_v2 = vpop.eup %1173 }
 0x380   :  { %889 = vadd.xlane.f32.xlu0 %v1174_v2 }
 0x40d   :  { %v890_v3 = vpop.xlane.xlu0 %889 }
 0x40e   :  { %1175 = vrcp.f32 %v890_v3 }
 0x418   :  { %v1176_v4 = vpop.eup %1175 }
 0x419   :  { %v892_v5 = vmul.f32 %v1176_v4, %v1174_v2 }
 0x41b   :  { %893 = vst [vmem:[#allocation5] sm:$0xff] %v892_v5 }
 0x41c   :  { %898 = vsyncadd [#allocation4], 96  ;;  %s1231_s4 = smov [#allocation5]  }
 0x41d   :  { %s899_s5 = sshll.u32 %s1231_s4, 4  ;;  %s900_s5 = int_to_ptr.vmem [resolvable:$true] %s899_s5 }
 0x41e   :  { %s1199_s6 = scalar_lea.vmem %s900_s5, 32  ;;  %s1203_s24 = scalar_lea.vmem %s900_s5, 128 }
 0x41f   :  { %p1200_p8 = scmp.ne.s32.totalorder %s900_s5, %s1199_s6  ;;  %p1204_p9 = scmp.lt.s32.totalorder %s900_s5, %s900_s5 }
 0x420   :  { %p1205_p10 = scmp.lt.s32.totalorder %s1203_s24, %s1199_s6 }
 0x422   :  { %p1206_p11 = por %p1205_p10, %p1204_p9 }
 0x424   :  { %p1207_p12 = pnand %p1206_p11, %p1200_p8 }
 0x426   :  { %1210 = shalt.err (!%p1207_p12)
}
 0x427   :  { %s1211_s27 = scalar_lea.hbm %s1381_s7, 32 }
 0x428   :  { %p1212_p13 = scmp.ne.s32.totalorder %s1381_s7, %s1211_s27  ;;  %p1215_p0 = scmp.lt.u32.totalorder %s1211_s27, %s1381_s7 }
 0x42a   :  { %p1217_p1 = pnand %p1215_p0, %p1212_p13 }
 0x42c   :  { %1220 = shalt.err (!%p1217_p1)
}
 0x42d   :  { %s1232_s9 = smov 32   ;;  %s1233_s10 = smov 2  }
 0x42e   :  { %905 = dma.vmem_to_hbm [thread:$0]  %s900_s5, 32, %s1381_s7, [#allocation4], %s1232_s9, %s1232_s9, %s1233_s10  }
 0x42f   :  { %1223 = dma.done.wait [#allocation4], 128  }
 0x430   :  { %1224 = vsyncadd [#allocation4], 4294967168 }
 0x431   :  { %909 = vsyncpa [#allocation3], 1 }
 0x432   :  { %910 = vsyncpa [#allocation4], 1 }

</bundles_post_ra>
